<compile_context>
chip_gen: v5e
topology: v5e:2x2
jax: 0.10.0
libtpu: 0.0.40
codegen_flags: <defaults>
</compile_context>

<pallas_src>
import math

import jax
import jax.numpy as jnp
from jax import lax
from jax.experimental import pallas as pl
from jax.experimental.pallas import tpu as pltpu

C_PAD = 128  # lane-dense class dimension for the logits output store


# ----------------------------------------------------------------------------
# Fused Pallas kernel: whole CustomCLIP inference forward in one call
# ----------------------------------------------------------------------------
def _mm(a, b, contract_rhs_last=False):
    """MXU matmul: bf16 operands, f32 accumulation, no materialized transpose."""
    dims = (((1,), (1,)), ((), ())) if contract_rhs_last else (((1,), (0,)), ((), ()))
    return lax.dot_general(
        a.astype(jnp.bfloat16), b.astype(jnp.bfloat16),
        dimension_numbers=dims, preferred_element_type=jnp.float32)


def _fused_clip_kernel(scale_ref, prompts_ref, text_pool_ref, w_text_ref,
                       patches_ref, w_patch_ref, img_pool_ref, w_proj_ref, o_ref):
    # --- text branch (stand-in TextEncoder): token mean-pool (as matmul) -> projection
    text_pooled = _mm(text_pool_ref[...], prompts_ref[...])    # (C_PAD, ctx_dim)
    text_feat = _mm(text_pooled, w_text_ref[...])              # (C_PAD, D)

    # --- image branch (stand-in visual): patch embed -> patch mean-pool -> projection
    emb = _mm(patches_ref[...], w_patch_ref[...])              # (B*P, width)
    pooled = _mm(img_pool_ref[...], emb)                       # (B, width)
    feats = _mm(pooled, w_proj_ref[...])                       # (B, D) == real_image_features_1

    # --- real_image_features = x / x.norm(dim=-1, keepdim=True)   (f32, EUP rsqrt) ---
    # NOTE: no epsilon, matching PyTorch .norm()+div (a zero row would be NaN there too).
    sumsq = jnp.sum(feats * feats, axis=-1, keepdims=True)
    img_n = feats * lax.rsqrt(sumsq)

    # --- logits = logit_scale * img_n @ text_features.T  (contract over D, no .T) ---
    logits = _mm(img_n, text_feat, contract_rhs_last=True)     # (B, C_PAD)
    o_ref[...] = scale_ref[0] * logits


def fused_clip_forward_call(scale, prompts2d, text_pool, w_text,
                            patches, w_patch, img_pool, w_proj):
    n_tok, ctx_dim = prompts2d.shape
    c_pad = text_pool.shape[0]
    bp, patch_dim = patches.shape
    b = img_pool.shape[0]
    width = w_patch.shape[1]
    embed = w_proj.shape[1]
    return pl.pallas_call(
        _fused_clip_kernel,
        out_shape=jax.ShapeDtypeStruct((b, c_pad), jnp.float32),
        grid=(1,),
        in_specs=[
            pl.BlockSpec(memory_space=pltpu.MemorySpace.SMEM),      # logit_scale.exp()
            pl.BlockSpec((n_tok, ctx_dim), lambda i: (0, 0)),       # padded prompt tokens
            pl.BlockSpec((c_pad, n_tok), lambda i: (0, 0)),         # token-pool matrix
            pl.BlockSpec((ctx_dim, embed), lambda i: (0, 0)),       # w_text
            pl.BlockSpec((bp, patch_dim), lambda i: (0, 0)),        # image patches
            pl.BlockSpec((patch_dim, width), lambda i: (0, 0)),     # w_patch
            pl.BlockSpec((b, bp), lambda i: (0, 0)),                # patch-pool matrix
            pl.BlockSpec((width, embed), lambda i: (0, 0)),         # w_img_proj
        ],
        out_specs=pl.BlockSpec((b, c_pad), lambda i: (0, 0)),
        compiler_params=pltpu.CompilerParams(dimension_semantics=("arbitrary",)),
    )(scale, prompts2d, text_pool, w_text, patches, w_patch, img_pool, w_proj)


# ----------------------------------------------------------------------------
# Synthetic CustomCLIP parameters (deterministic init)
# ----------------------------------------------------------------------------
def init_params(key, *, n_cls, n_ctx, ctx_dim, patch_dim, width, embed_dim,
                n_ctx_vision_syn=4, prompt_depth_vision=3):
    ks = jax.random.split(key, 8)
    return {
        # VLPromptLearner stand-in: learned prompts (n_cls, n_ctx, ctx_dim)
        "prompts": 0.02 * jax.random.normal(ks[0], (n_cls, n_ctx, ctx_dim), jnp.float32),
        # TextEncoder stand-in: ctx_dim -> embed_dim projection
        "w_text": 0.02 * jax.random.normal(ks[1], (ctx_dim, embed_dim), jnp.float32),
        # image encoder stand-in: patch embed + final projection
        "w_patch": 0.02 * jax.random.normal(ks[2], (patch_dim, width), jnp.float32),
        "w_img_proj": 0.02 * jax.random.normal(ks[3], (width, embed_dim), jnp.float32),
        # clip_model.logit_scale (CLIP default init)
        "logit_scale": jnp.asarray(math.log(1.0 / 0.07), jnp.float32),
        # self.syn_prompt (unused in the inference branch; kept to match __init__ shapes)
        "syn_prompt": [
            0.02 * jax.random.normal(ks[4 + d], (n_ctx_vision_syn, 768), jnp.float32)
            for d in range(prompt_depth_vision - 1)
        ],
    }


# ----------------------------------------------------------------------------
# JAX-side glue: patch extraction, class-dim padding, pooling matrices
# ----------------------------------------------------------------------------
def _prepare_inputs(params, real_batch, patch):
    n_cls, n_ctx, ctx_dim = params["prompts"].shape
    assert n_cls <= C_PAD

    B, C, H, W = real_batch.shape
    ph = pw = patch
    nh, nw = H // ph, W // pw
    P = nh * nw
    # NCHW -> (B, P, C*ph*pw) -> (B*P, patch_dim)
    x = real_batch.reshape(B, C, nh, ph, nw, pw)
    x = jnp.transpose(x, (0, 2, 4, 1, 3, 5)).reshape(B, P, C * ph * pw)
    patches = x.reshape(B * P, C * ph * pw)

    # zero-pad prompts to C_PAD classes (padded classes give exactly-0 logits, sliced off)
    prompts2d = jnp.zeros((C_PAD * n_ctx, ctx_dim), jnp.float32)
    prompts2d = prompts2d.at[: n_cls * n_ctx].set(
        params["prompts"].reshape(n_cls * n_ctx, ctx_dim))

    # mean-pooling expressed as matmuls (block-diagonal 1/n averaging matrices)
    text_pool = jnp.kron(jnp.eye(C_PAD, dtype=jnp.float32),
                         jnp.ones((1, n_ctx), jnp.float32) / n_ctx)   # (C_PAD, C_PAD*n_ctx)
    img_pool = jnp.kron(jnp.eye(B, dtype=jnp.float32),
                        jnp.ones((1, P), jnp.float32) / P)            # (B, B*P)

    scale = jnp.exp(params["logit_scale"]).reshape(1).astype(jnp.float32)
    return scale, prompts2d, text_pool, patches, img_pool


# ----------------------------------------------------------------------------
# CustomCLIP.forward (inference branch: real_label is None)
# ----------------------------------------------------------------------------
def custom_clip_forward(params, subsample, real_batch, *, patch=8):
    n_cls = params["prompts"].shape[0]
    seen = math.ceil(n_cls / 2)

    scale, prompts2d, text_pool, patches, img_pool = _prepare_inputs(
        params, real_batch, patch)

    logits_full = fused_clip_forward_call(
        scale, prompts2d, text_pool, params["w_text"],
        patches, params["w_patch"], img_pool, params["w_img_proj"])   # (B, C_PAD)

    logits_open_vocabu = logits_full[:, :n_cls]
    if subsample == "base":
        logits = logits_full[:, :seen]          # text_features[:ceil(n/2)].t()
    else:
        logits = logits_full[:, seen:n_cls]     # text_features[ceil(n/2):].t()
    return logits, logits_open_vocabu


# ----------------------------------------------------------------------------
# main
# ----------------------------------------------------------------------------
if __name__ == "__main__":
    key = jax.random.PRNGKey(0)
    k_params, k_img = jax.random.split(key)

    # small shapes
    B, C, H, W = 4, 3, 16, 16
    PATCH = 8
    N_CLS, N_CTX, CTX_DIM = 10, 4, 32
    WIDTH, EMBED = 128, 128
    PATCH_DIM = C * PATCH * PATCH

    params = init_params(
        k_params, n_cls=N_CLS, n_ctx=N_CTX, ctx_dim=CTX_DIM,
        patch_dim=PATCH_DIM, width=WIDTH, embed_dim=EMBED,
    )
    real_batch = jax.random.normal(k_img, (B, C, H, W), jnp.float32)

    logits, logits_open = custom_clip_forward(params, "base", real_batch, patch=PATCH)
    jax.block_until_ready((logits, logits_open))

    # pure-JAX reference mirroring the kernel's dtype path (bf16 MXU inputs, f32 accum)
    def ref_forward(params, real_batch, patch):
        bf, f32 = jnp.bfloat16, jnp.float32
        scale, prompts2d, text_pool, patches, img_pool = _prepare_inputs(
            params, real_batch, patch)
        dot = lambda a, b: jnp.dot(a.astype(bf), b.astype(bf),
                                   preferred_element_type=f32)
        txt = dot(dot(text_pool, prompts2d), params["w_text"])      # (C_PAD, D)
        feats = dot(dot(dot(patches, params["w_patch"])[None][0] * 1.0,
                        jnp.eye(WIDTH, dtype=f32)), params["w_img_proj"])  # placeholder path
        # (exact mirror of the kernel's image path:)
        emb = dot(patches, params["w_patch"])
        pooled = dot(img_pool, emb)
        feats = dot(pooled, params["w_img_proj"])
        img_n = feats * jax.lax.rsqrt(jnp.sum(feats * feats, -1, keepdims=True))
        return scale[0] * dot(img_n, txt.T)                          # (B, C_PAD)

    expect_full = ref_forward(params, real_batch, PATCH)
    seen = math.ceil(N_CLS / 2)
    assert logits.shape == (B, seen)
    assert logits_open.shape == (B, N_CLS)
    assert jnp.allclose(logits_open, expect_full[:, :N_CLS], atol=2e-2, rtol=2e-2)
    assert jnp.allclose(logits, expect_full[:, :seen], atol=2e-2, rtol=2e-2)

    print("KERNEL_OK")
</pallas_src>

<mosaic_0001>
module attributes {stable_mosaic.version = 11 : i64} {
  func.func @_fused_clip_kernel(%arg0: i32, %arg1: memref<1xf32, #tpu.memory_space<smem>>, %arg2: memref<512x32xf32, #tpu.memory_space<vmem>>, %arg3: memref<128x512xf32, #tpu.memory_space<vmem>>, %arg4: memref<32x128xf32, #tpu.memory_space<vmem>>, %arg5: memref<16x192xf32, #tpu.memory_space<vmem>>, %arg6: memref<192x128xf32, #tpu.memory_space<vmem>>, %arg7: memref<4x16xf32, #tpu.memory_space<vmem>>, %arg8: memref<128x128xf32, #tpu.memory_space<vmem>>, %arg9: memref<4x128xf32, #tpu.memory_space<vmem>>) attributes {dimension_semantics = [#tpu.dimension_semantics<arbitrary>], iteration_bounds = array<i64: 1>, scalar_prefetch = 0 : i64, scratch_operands = 0 : i64, tpu.core_type = #tpu.core_type<tc>, window_params = [{transform_indices = @transform_0, window_bounds = array<i64: 1>}, {pipeline_mode = #tpu.pipeline_mode<synchronous>, transform_indices = @transform_1, window_bounds = array<i64: 512, 32>}, {pipeline_mode = #tpu.pipeline_mode<synchronous>, transform_indices = @transform_2, window_bounds = array<i64: 128, 512>}, {pipeline_mode = #tpu.pipeline_mode<synchronous>, transform_indices = @transform_3, window_bounds = array<i64: 32, 128>}, {pipeline_mode = #tpu.pipeline_mode<synchronous>, transform_indices = @transform_4, window_bounds = array<i64: 16, 192>}, {pipeline_mode = #tpu.pipeline_mode<synchronous>, transform_indices = @transform_5, window_bounds = array<i64: 192, 128>}, {pipeline_mode = #tpu.pipeline_mode<synchronous>, transform_indices = @transform_6, window_bounds = array<i64: 4, 16>}, {pipeline_mode = #tpu.pipeline_mode<synchronous>, transform_indices = @transform_7, window_bounds = array<i64: 128, 128>}, {pipeline_mode = #tpu.pipeline_mode<synchronous>, transform_indices = @transform_8, window_bounds = array<i64: 4, 128>}]} {
    %c0 = arith.constant 0 : index
    %c0_0 = arith.constant 0 : index
    %0 = vector.load %arg3[%c0, %c0_0] : memref<128x512xf32, #tpu.memory_space<vmem>>, vector<128x512xf32>
    %c0_1 = arith.constant 0 : index
    %c0_2 = arith.constant 0 : index
    %1 = vector.load %arg2[%c0_1, %c0_2] : memref<512x32xf32, #tpu.memory_space<vmem>>, vector<512x32xf32>
    %2 = arith.truncf %0 : vector<128x512xf32> to vector<128x512xbf16>
    %3 = arith.truncf %1 : vector<512x32xf32> to vector<512x32xbf16>
    %cst = arith.constant dense<0.000000e+00> : vector<128x32xf32>
    %4 = tpu.matmul %2, %3, %cst {dimension_numbers = #tpu.dot_dimension_numbers<[1], [0], [0], [1], [0, 0, 1, 1], [], []>} : vector<128x512xbf16>, vector<512x32xbf16>, vector<128x32xf32> -> vector<128x32xf32>
    %c0_3 = arith.constant 0 : index
    %c0_4 = arith.constant 0 : index
    %5 = vector.load %arg4[%c0_3, %c0_4] : memref<32x128xf32, #tpu.memory_space<vmem>>, vector<32x128xf32>
    %6 = arith.truncf %4 : vector<128x32xf32> to vector<128x32xbf16>
    %7 = arith.truncf %5 : vector<32x128xf32> to vector<32x128xbf16>
    %cst_5 = arith.constant dense<0.000000e+00> : vector<128x128xf32>
    %8 = tpu.matmul %6, %7, %cst_5 {dimension_numbers = #tpu.dot_dimension_numbers<[1], [0], [0], [1], [0, 0, 1, 1], [], []>} : vector<128x32xbf16>, vector<32x128xbf16>, vector<128x128xf32> -> vector<128x128xf32>
    %c0_6 = arith.constant 0 : index
    %c0_7 = arith.constant 0 : index
    %9 = vector.load %arg5[%c0_6, %c0_7] : memref<16x192xf32, #tpu.memory_space<vmem>>, vector<16x192xf32>
    %c0_8 = arith.constant 0 : index
    %c0_9 = arith.constant 0 : index
    %10 = vector.load %arg6[%c0_8, %c0_9] : memref<192x128xf32, #tpu.memory_space<vmem>>, vector<192x128xf32>
    %11 = arith.truncf %9 : vector<16x192xf32> to vector<16x192xbf16>
    %12 = arith.truncf %10 : vector<192x128xf32> to vector<192x128xbf16>
    %cst_10 = arith.constant dense<0.000000e+00> : vector<16x128xf32>
    %13 = tpu.matmul %11, %12, %cst_10 {dimension_numbers = #tpu.dot_dimension_numbers<[1], [0], [0], [1], [0, 0, 1, 1], [], []>} : vector<16x192xbf16>, vector<192x128xbf16>, vector<16x128xf32> -> vector<16x128xf32>
    %c0_11 = arith.constant 0 : index
    %c0_12 = arith.constant 0 : index
    %14 = vector.load %arg7[%c0_11, %c0_12] : memref<4x16xf32, #tpu.memory_space<vmem>>, vector<4x16xf32>
    %15 = arith.truncf %14 : vector<4x16xf32> to vector<4x16xbf16>
    %16 = arith.truncf %13 : vector<16x128xf32> to vector<16x128xbf16>
    %cst_13 = arith.constant dense<0.000000e+00> : vector<4x128xf32>
    %17 = tpu.matmul %15, %16, %cst_13 {dimension_numbers = #tpu.dot_dimension_numbers<[1], [0], [0], [1], [0, 0, 1, 1], [], []>} : vector<4x16xbf16>, vector<16x128xbf16>, vector<4x128xf32> -> vector<4x128xf32>
    %c0_14 = arith.constant 0 : index
    %c0_15 = arith.constant 0 : index
    %18 = vector.load %arg8[%c0_14, %c0_15] : memref<128x128xf32, #tpu.memory_space<vmem>>, vector<128x128xf32>
    %19 = arith.truncf %17 : vector<4x128xf32> to vector<4x128xbf16>
    %20 = arith.truncf %18 : vector<128x128xf32> to vector<128x128xbf16>
    %cst_16 = arith.constant dense<0.000000e+00> : vector<4x128xf32>
    %21 = tpu.matmul %19, %20, %cst_16 {dimension_numbers = #tpu.dot_dimension_numbers<[1], [0], [0], [1], [0, 0, 1, 1], [], []>} : vector<4x128xbf16>, vector<128x128xbf16>, vector<4x128xf32> -> vector<4x128xf32>
    %22 = arith.mulf %21, %21 : vector<4x128xf32>
    %cst_17 = arith.constant dense<0.000000e+00> : vector<4xf32>
    %23 = vector.multi_reduction <add>, %22, %cst_17 [1] : vector<4x128xf32> to vector<4xf32>
    %24 = vector.shape_cast %23 : vector<4xf32> to vector<4x1xf32>
    %25 = math.rsqrt %24 : vector<4x1xf32>
    %26 = vector.broadcast %25 : vector<4x1xf32> to vector<4x128xf32>
    %27 = arith.mulf %21, %26 : vector<4x128xf32>
    %28 = arith.truncf %27 : vector<4x128xf32> to vector<4x128xbf16>
    %29 = arith.truncf %8 : vector<128x128xf32> to vector<128x128xbf16>
    %cst_18 = arith.constant dense<0.000000e+00> : vector<4x128xf32>
    %30 = tpu.matmul %28, %29, %cst_18 {dimension_numbers = #tpu.dot_dimension_numbers<[1], [1], [0], [0], [0, 0, 1, 0], [], []>} : vector<4x128xbf16>, vector<128x128xbf16>, vector<4x128xf32> -> vector<4x128xf32>
    %c0_19 = arith.constant 0 : index
    %31 = memref.load %arg1[%c0_19] : memref<1xf32, #tpu.memory_space<smem>>
    %32 = vector.broadcast %31 : f32 to vector<4x128xf32>
    %33 = arith.mulf %32, %30 : vector<4x128xf32>
    %c0_20 = arith.constant 0 : index
    %c0_21 = arith.constant 0 : index
    %34 = vector.load %arg9[%c0_20, %c0_21] : memref<4x128xf32, #tpu.memory_space<vmem>>, vector<4x128xf32>
    tpu.vector_store %arg9[%c0_20, %c0_21], %33 {strides = array<i32>} : memref<4x128xf32, #tpu.memory_space<vmem>>, vector<4x128xf32>,
    return
  }
  func.func @transform_0(%arg0: i32) -> i32 {
    %c0_i32 = arith.constant 0 : i32
    %c0_i32_0 = arith.constant 0 : i32
    return %c0_i32 : i32
  }
  func.func @transform_1(%arg0: i32) -> (i32, i32) {
    %c0_i32 = arith.constant 0 : i32
    %c0_i32_0 = arith.constant 0 : i32
    %c0_i32_1 = arith.constant 0 : i32
    return %c0_i32, %c0_i32_0 : i32, i32
  }
  func.func @transform_2(%arg0: i32) -> (i32, i32) {
    %c0_i32 = arith.constant 0 : i32
    %c0_i32_0 = arith.constant 0 : i32
    %c0_i32_1 = arith.constant 0 : i32
    return %c0_i32, %c0_i32_0 : i32, i32
  }
  func.func @transform_3(%arg0: i32) -> (i32, i32) {
    %c0_i32 = arith.constant 0 : i32
    %c0_i32_0 = arith.constant 0 : i32
    %c0_i32_1 = arith.constant 0 : i32
    return %c0_i32, %c0_i32_0 : i32, i32
  }
  func.func @transform_4(%arg0: i32) -> (i32, i32) {
    %c0_i32 = arith.constant 0 : i32
    %c0_i32_0 = arith.constant 0 : i32
    %c0_i32_1 = arith.constant 0 : i32
    return %c0_i32, %c0_i32_0 : i32, i32
  }
  func.func @transform_5(%arg0: i32) -> (i32, i32) {
    %c0_i32 = arith.constant 0 : i32
    %c0_i32_0 = arith.constant 0 : i32
    %c0_i32_1 = arith.constant 0 : i32
    return %c0_i32, %c0_i32_0 : i32, i32
  }
  func.func @transform_6(%arg0: i32) -> (i32, i32) {
    %c0_i32 = arith.constant 0 : i32
    %c0_i32_0 = arith.constant 0 : i32
    %c0_i32_1 = arith.constant 0 : i32
    return %c0_i32, %c0_i32_0 : i32, i32
  }
  func.func @transform_7(%arg0: i32) -> (i32, i32) {
    %c0_i32 = arith.constant 0 : i32
    %c0_i32_0 = arith.constant 0 : i32
    %c0_i32_1 = arith.constant 0 : i32
    return %c0_i32, %c0_i32_0 : i32, i32
  }
  func.func @transform_8(%arg0: i32) -> (i32, i32) {
    %c0_i32 = arith.constant 0 : i32
    %c0_i32_0 = arith.constant 0 : i32
    %c0_i32_1 = arith.constant 0 : i32
    return %c0_i32, %c0_i32_0 : i32, i32
  }
}

</mosaic_0001>

<bundles_post_ra>
// kernel: tpu_custom_call.1
= control target key start
LH: loop header
LB: loop body
LE: loop exit
PB: predicated region body
PF: predicated region fallthrough
CT: control target
= control target key end

     0   :  { %14 = vsyncpa [#allocation4], 0  ;;  %s1418_s0 = inlined_call_operand.<no memory space> [shape: f32[1], index: 0, kind: input, shape index: {}]   ;;  %s1419_s1 = inlined_call_operand.vmem [shape: f32[512,32], index: 1, kind: input, shape index: {}]   ;;  %s1420_s2 = inlined_call_operand.vmem [shape: f32[128,512], index: 2, kind: input, shape index: {}]   ;;  %s1421_s3 = inlined_call_operand.hbm [shape: f32[32,128], index: 3, kind: input, shape index: {}]   ;;  %s1422_s4 = inlined_call_operand.hbm [shape: f32[16,192], index: 4, kind: input, shape index: {}]   ;;  %s1423_s5 = inlined_call_operand.hbm [shape: f32[192,128], index: 5, kind: input, shape index: {}]   ;;  %s1424_s6 = inlined_call_operand.vmem [shape: f32[4,16], index: 6, kind: input, shape index: {}]   ;;  %s1425_s7 = inlined_call_operand.vmem [shape: f32[128,128], index: 7, kind: input, shape index: {}]   ;;  %s1426_s8 = inlined_call_operand.hbm [shape: f32[4,128], index: 8, kind: output, shape index: {}]  }
   0x1   :  { %15 = vsyncpa [#allocation7], 0  ;;  %s40_s29 = sshll.u32 %s1422_s4, 4  ;;  %s41_s29 = int_to_ptr.hbm [resolvable:$true] %s40_s29 }
   0x2   :  { %16 = vsyncpa [#allocation5], 0  ;;  %s877_s30 = smov [#allocation6]   ;;  %s27_s12 = sshll.u32 %s1421_s3, 4  ;;  %s28_s12 = int_to_ptr.hbm [resolvable:$true] %s27_s12 }
   0x3   :  { %s42_s9 = sshll.u32 %s877_s30, 4  ;;  %s878_s13 = smov 256   ;;  %s43_s9 = int_to_ptr.vmem [resolvable:$true] %s42_s9 }
   0x4   :  { %s879_s14 = smov 16   ;;  %s880_s15 = smov [#allocation3]  }
   0x5   :  { %48 = dma.hbm_to_vmem [thread:$0]  %s41_s29, 512, %s43_s9, [#allocation7], %s878_s13, %s878_s13, %s879_s14  }
   0x6   :  { %s29_s16 = sshll.u32 %s880_s15, 4  ;;  %s881_s17 = smov 128   ;;  %s30_s16 = int_to_ptr.vmem [resolvable:$true] %s29_s16 }
   0x7   :  { %s882_s18 = smov 8   ;;  %s53_s20 = sshll.u32 %s1423_s5, 4  ;;  %s54_s20 = int_to_ptr.hbm [resolvable:$true] %s53_s20 }
   0x8   :  { %35 = dma.hbm_to_vmem [thread:$0]  %s28_s12, 512, %s30_s16, [#allocation4], %s881_s17, %s881_s17, %s882_s18  }
   0x9   :  { %s883_s21 = smov [#allocation8]  }
   0xa   :  { %s55_s22 = sshll.u32 %s883_s21, 4  ;;  %s56_s22 = int_to_ptr.vmem [resolvable:$true] %s55_s22 }
   0xb   :  { %61 = dma.hbm_to_vmem [thread:$0]  %s54_s20, 3072, %s56_s22, [#allocation7], %s881_s17, %s881_s17, %s882_s18  }
   0xc   :  { %871 = dma.done.wait [#allocation4], 512  }
   0xd   :  { %872 = vsyncadd [#allocation4], 4294966784 }
   0xe   :  { %873 = dma.done.wait [#allocation7], 3584  }
   0xf   :  { %874 = vsyncadd [#allocation7], 4294963712  ;;  %v157_v0 = vld [vmem:[%s1419_s1 + $0x70] sm:$0xff]  ;;  %v158_v1 = vld [vmem:[%s1419_s1 + $0x78] sm:$0xff]  ;;  %vm597_vm0 = vcmask 523264   ;;  %vm481_vm1 = vcmask 261120  }
  0x10   :  { %v173_v2 = vld [vmem:[%s1419_s1 + $0xf0] sm:$0xff]  ;;  %v246_v3 = vpack.c.bf16 %v158_v1, %v157_v0  ;;  %v174_v4 = vld [vmem:[%s1419_s1 + $0xf8] sm:$0xff]  ;;  %v155_v9 = vld [vmem:[%s1419_s1 + $0x60] sm:$0xff]  ;;  %vm632_vm2 = vcmask 130048   ;;  %vm688_vm3 = vcmask 1043456   ;;  %s884_s28 = smov [#allocation9]  }
  0x11   :  { %v189_v5 = vld [vmem:[%s1419_s1 + $0x170] sm:$0xff]  ;;  %v190_v6 = vld [vmem:[%s1419_s1 + $0x178] sm:$0xff]  ;;  %v254_v7 = vpack.c.bf16 %v174_v4, %v173_v2  ;;  %v156_v10 = vld [vmem:[%s1419_s1 + $0x68] sm:$0xff]  ;;  %s734_s29 = sshll.u32 %s884_s28, 4  ;;  %s736_s10 = sshll.u32 %s1426_s8, 4  ;;  %s735_s29 = int_to_ptr.vmem [resolvable:$true] %s734_s29  ;;  %s737_s10 = int_to_ptr.hbm [resolvable:$true] %s736_s10 }
  0x12   :  { %v262_v8 = vpack.c.bf16 %v190_v6, %v189_v5  ;;  %v171_v11 = vld [vmem:[%s1419_s1 + $0xe0] sm:$0xff]  ;;  %271 = vmatpush.bf16.msra.mxu0 %v246_v3  ;;  %757 = vmatpush.bf16.msra.mxu3 %v246_v3  ;;  %v245_v12 = vpack.c.bf16 %v156_v10, %v155_v9  ;;  %v172_v13 = vld [vmem:[%s1419_s1 + $0xe8] sm:$0xff]  ;;  %v153_v18 = vld [vmem:[%s1419_s1 + $0x50] sm:$0xff] }
  0x13   :  { %v187_v14 = vld [vmem:[%s1419_s1 + $0x160] sm:$0xff]  ;;  %v188_v15 = vld [vmem:[%s1419_s1 + $0x168] sm:$0xff]  ;;  %320 = vmatpush.bf16.msra.mxu1 %v254_v7  ;;  %v253_v16 = vpack.c.bf16 %v172_v13, %v171_v11  ;;  %v154_v19 = vld [vmem:[%s1419_s1 + $0x58] sm:$0xff] }
  0x14   :  { %369 = vmatpush.bf16.msra.mxu2 %v262_v8  ;;  %v261_v17 = vpack.c.bf16 %v188_v15, %v187_v14  ;;  %v169_v20 = vld [vmem:[%s1419_s1 + $0xd0] sm:$0xff]  ;;  %v170_v21 = vld [vmem:[%s1419_s1 + $0xd8] sm:$0xff]  ;;  %v244_v24 = vpack.c.bf16 %v154_v19, %v153_v18  ;;  %v151_v27 = vld [vmem:[%s1419_s1 + $0x40] sm:$0xff] }
  0x15   :  { %v185_v22 = vld [vmem:[%s1419_s1 + $0x150] sm:$0xff]  ;;  %v186_v23 = vld [vmem:[%s1419_s1 + $0x158] sm:$0xff]  ;;  %v252_v25 = vpack.c.bf16 %v170_v21, %v169_v20  ;;  %v152_v28 = vld [vmem:[%s1419_s1 + $0x48] sm:$0xff] }
  0x16   :  { %272 = vmatpush.bf16.msra.mxu0 %v245_v12  ;;  %758 = vmatpush.bf16.msra.mxu3 %v245_v12  ;;  %v260_v26 = vpack.c.bf16 %v186_v23, %v185_v22  ;;  %v167_v29 = vld [vmem:[%s1419_s1 + $0xc0] sm:$0xff]  ;;  %v168_v30 = vld [vmem:[%s1419_s1 + $0xc8] sm:$0xff]  ;;  %v243_v33 = vpack.c.bf16 %v152_v28, %v151_v27  ;;  %v149_v36 = vld [vmem:[%s1419_s1 + $0x30] sm:$0xff] }
  0x17   :  { %321 = vmatpush.bf16.msra.mxu1 %v253_v16  ;;  %v183_v31 = vld [vmem:[%s1419_s1 + $0x140] sm:$0xff]  ;;  %v184_v32 = vld [vmem:[%s1419_s1 + $0x148] sm:$0xff]  ;;  %v251_v34 = vpack.c.bf16 %v168_v30, %v167_v29  ;;  %v150_v37 = vld [vmem:[%s1419_s1 + $0x38] sm:$0xff] }
  0x18   :  { %370 = vmatpush.bf16.msra.mxu2 %v261_v17  ;;  %v259_v35 = vpack.c.bf16 %v184_v32, %v183_v31  ;;  %v165_v38 = vld [vmem:[%s1419_s1 + $0xb0] sm:$0xff]  ;;  %v166_v39 = vld [vmem:[%s1419_s1 + $0xb8] sm:$0xff]  ;;  %v242_v42 = vpack.c.bf16 %v150_v37, %v149_v36  ;;  %v147_v45 = vld [vmem:[%s1419_s1 + $0x20] sm:$0xff] }
  0x19   :  { %v181_v40 = vld [vmem:[%s1419_s1 + $0x130] sm:$0xff]  ;;  %v182_v41 = vld [vmem:[%s1419_s1 + $0x138] sm:$0xff]  ;;  %v250_v43 = vpack.c.bf16 %v166_v39, %v165_v38  ;;  %v148_v46 = vld [vmem:[%s1419_s1 + $0x28] sm:$0xff] }
  0x1a   :  { %273 = vmatpush.bf16.msra.mxu0 %v244_v24  ;;  %759 = vmatpush.bf16.msra.mxu3 %v244_v24  ;;  %v258_v44 = vpack.c.bf16 %v182_v41, %v181_v40  ;;  %v163_v47 = vld [vmem:[%s1419_s1 + $0xa0] sm:$0xff]  ;;  %v164_v48 = vld [vmem:[%s1419_s1 + $0xa8] sm:$0xff]  ;;  %v241_v51 = vpack.c.bf16 %v148_v46, %v147_v45  ;;  %v145_v54 = vld [vmem:[%s1419_s1 + $0x10] sm:$0xff] }
  0x1b   :  { %322 = vmatpush.bf16.msra.mxu1 %v252_v25  ;;  %v179_v49 = vld [vmem:[%s1419_s1 + $0x120] sm:$0xff]  ;;  %v180_v50 = vld [vmem:[%s1419_s1 + $0x128] sm:$0xff]  ;;  %v249_v52 = vpack.c.bf16 %v164_v48, %v163_v47  ;;  %v146_v55 = vld [vmem:[%s1419_s1 + $0x18] sm:$0xff] }
  0x1c   :  { %371 = vmatpush.bf16.msra.mxu2 %v260_v26  ;;  %v257_v53 = vpack.c.bf16 %v180_v50, %v179_v49  ;;  %v161_v56 = vld [vmem:[%s1419_s1 + $0x90] sm:$0xff]  ;;  %v162_v57 = vld [vmem:[%s1419_s1 + $0x98] sm:$0xff]  ;;  %v240_v60 = vpack.c.bf16 %v146_v55, %v145_v54  ;;  %v143_v61 = vld [vmem:[%s1419_s1] sm:$0xff] }
  0x1d   :  { %v177_v58 = vld [vmem:[%s1419_s1 + $0x110] sm:$0xff]  ;;  %v178_v59 = vld [vmem:[%s1419_s1 + $0x118] sm:$0xff]  ;;  %v248_v62 = vpack.c.bf16 %v162_v57, %v161_v56  ;;  %v144_v0 = vld [vmem:[%s1419_s1 + $0x8] sm:$0xff] }
  0x1e   :  { %274 = vmatpush.bf16.msra.mxu0 %v243_v33  ;;  %760 = vmatpush.bf16.msra.mxu3 %v243_v33  ;;  %v256_v63 = vpack.c.bf16 %v178_v59, %v177_v58  ;;  %v159_v1 = vld [vmem:[%s1419_s1 + $0x80] sm:$0xff]  ;;  %v160_v2 = vld [vmem:[%s1419_s1 + $0x88] sm:$0xff]  ;;  %v205_v7 = vld [vmem:[%s1419_s1 + $0x1f0] sm:$0xff]  ;;  %v239_v9 = vpack.c.bf16 %v144_v0, %v143_v61 }
  0x1f   :  { %323 = vmatpush.bf16.msra.mxu1 %v251_v34  ;;  %v175_v3 = vld [vmem:[%s1419_s1 + $0x100] sm:$0xff]  ;;  %v176_v4 = vld [vmem:[%s1419_s1 + $0x108] sm:$0xff]  ;;  %v206_v8 = vld [vmem:[%s1419_s1 + $0x1f8] sm:$0xff]  ;;  %v247_v13 = vpack.c.bf16 %v160_v2, %v159_v1 }
  0x20   :  { %372 = vmatpush.bf16.msra.mxu2 %v259_v35  ;;  %v79_v5 = vld [vmem:[%s1420_s2] sm:$0xff]  ;;  %v80_v12 = vld [vmem:[%s1420_s2 + $0x8] sm:$0xff]  ;;  %v255_v14 = vpack.c.bf16 %v176_v4, %v175_v3  ;;  %v81_v16 = vld [vmem:[%s1420_s2 + $0x10] sm:$0xff]  ;;  %v270_v18 = vpack.c.bf16 %v206_v8, %v205_v7 }
  0x21   :  { %v83_v6 = vld [vmem:[%s1420_s2 + $0x20] sm:$0xff]  ;;  %v84_v15 = vld [vmem:[%s1420_s2 + $0x28] sm:$0xff]  ;;  %v85_v17 = vld [vmem:[%s1420_s2 + $0x30] sm:$0xff] }
  0x22   :  { %275 = vmatpush.bf16.msra.mxu0 %v242_v42  ;;  %761 = vmatpush.bf16.msra.mxu3 %v242_v42  ;;  %v119_v10 = vld [vmem:[%s1420_s2 + $0x140] sm:$0xff]  ;;  %v207_v19 = vpack.c.bf16 %v83_v6, %v79_v5  ;;  %v204_v22 = vld [vmem:[%s1419_s1 + $0x1e8] sm:$0xff]  ;;  %v208_v23 = vpack.c.bf16 %v84_v15, %v80_v12  ;;  %v209_v24 = vpack.c.bf16 %v85_v17, %v81_v16  ;;  %v201_v26 = vld [vmem:[%s1419_s1 + $0x1d0] sm:$0xff] }
  0x23   :  { %324 = vmatpush.bf16.msra.mxu1 %v250_v43  ;;  %v123_v11 = vld [vmem:[%s1420_s2 + $0x160] sm:$0xff]  ;;  %v202_v27 = vld [vmem:[%s1419_s1 + $0x1d8] sm:$0xff]  ;;  %v200_v30 = vld [vmem:[%s1419_s1 + $0x1c8] sm:$0xff] }
  0x24   :  { %373 = vmatpush.bf16.msra.mxu2 %v258_v44  ;;  %v227_v20 = vpack.c.bf16 %v123_v11, %v119_v10  ;;  %v203_v21 = vld [vmem:[%s1419_s1 + $0x1e0] sm:$0xff]  ;;  %v268_v28 = vpack.c.bf16 %v202_v27, %v201_v26  ;;  %v197_v34 = vld [vmem:[%s1419_s1 + $0x1b0] sm:$0xff]  ;;  %v198_v35 = vld [vmem:[%s1419_s1 + $0x1b8] sm:$0xff] }
  0x25   :  { %v269_v25 = vpack.c.bf16 %v204_v22, %v203_v21  ;;  %v199_v29 = vld [vmem:[%s1419_s1 + $0x1c0] sm:$0xff]  ;;  %v88_v38 = vld [vmem:[%s1420_s2 + $0x48] sm:$0xff]  ;;  %v89_v40 = vld [vmem:[%s1420_s2 + $0x50] sm:$0xff]  ;;  %v266_v42 = vpack.c.bf16 %v198_v35, %v197_v34 }
  0x26   :  { %276 = vmatpush.bf16.msra.mxu0 %v241_v51  ;;  %762 = vmatpush.bf16.msra.mxu3 %v241_v51  ;;  %v87_v31 = vld [vmem:[%s1420_s2 + $0x40] sm:$0xff]  ;;  %v267_v32 = vpack.c.bf16 %v200_v30, %v199_v29  ;;  %v92_v39 = vld [vmem:[%s1420_s2 + $0x68] sm:$0xff]  ;;  %v93_v41 = vld [vmem:[%s1420_s2 + $0x70] sm:$0xff] }
  0x27   :  { %325 = vmatpush.bf16.msra.mxu1 %v249_v52  ;;  %v91_v33 = vld [vmem:[%s1420_s2 + $0x60] sm:$0xff]  ;;  %v196_v46 = vld [vmem:[%s1419_s1 + $0x1a8] sm:$0xff]  ;;  %v212_v47 = vpack.c.bf16 %v92_v39, %v88_v38  ;;  %v213_v48 = vpack.c.bf16 %v93_v41, %v89_v40  ;;  %v193_v50 = vld [vmem:[%s1419_s1 + $0x190] sm:$0xff] }
  0x28   :  { %374 = vmatpush.bf16.msra.mxu2 %v257_v53  ;;  %v127_v36 = vld [vmem:[%s1420_s2 + $0x180] sm:$0xff]  ;;  %v211_v43 = vpack.c.bf16 %v91_v33, %v87_v31  ;;  %v194_v51 = vld [vmem:[%s1419_s1 + $0x198] sm:$0xff]  ;;  %v192_v54 = vld [vmem:[%s1419_s1 + $0x188] sm:$0xff] }
  0x29   :  { %v131_v37 = vld [vmem:[%s1420_s2 + $0x1a0] sm:$0xff]  ;;  %v264_v52 = vpack.c.bf16 %v194_v51, %v193_v50  ;;  %v100_v61 = vld [vmem:[%s1420_s2 + $0xa8] sm:$0xff]  ;;  %v82_v7 = vld [vmem:[%s1420_s2 + $0x18] sm:$0xff] }
  0x2a   :  { %277 = vmatpush.bf16.msra.mxu0 %v240_v60  ;;  %763 = vmatpush.bf16.msra.mxu3 %v240_v60  ;;  %v231_v44 = vpack.c.bf16 %v131_v37, %v127_v36  ;;  %v195_v45 = vld [vmem:[%s1419_s1 + $0x1a0] sm:$0xff]  ;;  %v96_v60 = vld [vmem:[%s1420_s2 + $0x88] sm:$0xff]  ;;  %v86_v8 = vld [vmem:[%s1420_s2 + $0x38] sm:$0xff] }
  0x2b   :  { %326 = vmatpush.bf16.msra.mxu1 %v248_v62  ;;  %v265_v49 = vpack.c.bf16 %v196_v46, %v195_v45  ;;  %v191_v53 = vld [vmem:[%s1419_s1 + $0x180] sm:$0xff]  ;;  %v97_v62 = vld [vmem:[%s1420_s2 + $0x90] sm:$0xff]  ;;  %v216_v2 = vpack.c.bf16 %v100_v61, %v96_v60  ;;  %v104_v6 = vld [vmem:[%s1420_s2 + $0xc8] sm:$0xff] }
  0x2c   :  { %375 = vmatpush.bf16.msra.mxu2 %v256_v63  ;;  %v263_v55 = vpack.c.bf16 %v192_v54, %v191_v53  ;;  %v95_v56 = vld [vmem:[%s1420_s2 + $0x80] sm:$0xff]  ;;  %v101_v63 = vld [vmem:[%s1420_s2 + $0xb0] sm:$0xff]  ;;  %v116_v21 = vld [vmem:[%s1420_s2 + $0x128] sm:$0xff] }
  0x2d   :  { %v99_v57 = vld [vmem:[%s1420_s2 + $0xa0] sm:$0xff]  ;;  %v217_v3 = vpack.c.bf16 %v101_v63, %v97_v62  ;;  %v105_v10 = vld [vmem:[%s1420_s2 + $0xd0] sm:$0xff]  ;;  %v574_v29 = vld [vmem:[#allocation8 + $0x78] sm:$0xff] }
  0x2e   :  { %278 = vmatpush.bf16.msra.mxu0 %v239_v9  ;;  %764 = vmatpush.bf16.msra.mxu3 %v239_v9  ;;  %v135_v58 = vld [vmem:[%s1420_s2 + $0x1c0] sm:$0xff]  ;;  %v215_v0 = vpack.c.bf16 %v99_v57, %v95_v56  ;;  %v108_v9 = vld [vmem:[%s1420_s2 + $0xe8] sm:$0xff]  ;;  %v109_v11 = vld [vmem:[%s1420_s2 + $0xf0] sm:$0xff] }
  0x2f   :  { %327 = vmatpush.bf16.msra.mxu1 %v247_v13  ;;  %v139_v59 = vld [vmem:[%s1420_s2 + $0x1e0] sm:$0xff]  ;;  %v210_v13 = vpack.c.bf16 %v86_v8, %v82_v7  ;;  %v221_v15 = vpack.c.bf16 %v109_v11, %v105_v10  ;;  %v113_v22 = vld [vmem:[%s1420_s2 + $0x110] sm:$0xff]  ;;  %v570_v35 = vld [vmem:[#allocation8 + $0x58] sm:$0xff] }
  0x30   :  { %376 = vmatpush.bf16.msra.mxu2 %v255_v14  ;;  %v235_v1 = vpack.c.bf16 %v139_v59, %v135_v58  ;;  %v103_v4 = vld [vmem:[%s1420_s2 + $0xc0] sm:$0xff]  ;;  %v220_v14 = vpack.c.bf16 %v108_v9, %v104_v6  ;;  %v569_v34 = vld [vmem:[#allocation8 + $0x50] sm:$0xff]  ;;  %v568_v38 = vld [vmem:[#allocation8 + $0x48] sm:$0xff] }
  0x31   :  { %279 = vmatmul.bf16.vlgmr.msra.gmra.mxu0 %v207_v19  ;;  %304 = vmatmul.bf16.vlgmr.msra.gmra.mxu3 %v227_v20  ;;  %v107_v5 = vld [vmem:[%s1420_s2 + $0xe0] sm:$0xff]  ;;  %v90_v19 = vld [vmem:[%s1420_s2 + $0x58] sm:$0xff]  ;;  %v590_v36 = vpack.c.bf16 %v570_v35, %v569_v34  ;;  %v120_v39 = vld [vmem:[%s1420_s2 + $0x148] sm:$0xff] }
  0x32   :  { %418 = vmatpush.bf16.msrb.mxu3 %v270_v18  ;;  %328 = vmatmul.bf16.vlgmr.msra.gmra.mxu1 %v208_v23  ;;  %v219_v12 = vpack.c.bf16 %v107_v5, %v103_v4  ;;  %v111_v16 = vld [vmem:[%s1420_s2 + $0x100] sm:$0xff]  ;;  %v112_v18 = vld [vmem:[%s1420_s2 + $0x108] sm:$0xff]  ;;  %v94_v20 = vld [vmem:[%s1420_s2 + $0x78] sm:$0xff] }
  0x33   :  { %377 = vmatmul.bf16.vlgmr.msra.gmra.mxu2 %v209_v24  ;;  %v115_v17 = vld [vmem:[%s1420_s2 + $0x120] sm:$0xff]  ;;  %v117_v23 = vld [vmem:[%s1420_s2 + $0x130] sm:$0xff]  ;;  %v224_v26 = vpack.c.bf16 %v116_v21, %v112_v18  ;;  %v98_v40 = vld [vmem:[%s1420_s2 + $0x98] sm:$0xff] }
  0x34   :  { %v223_v24 = vpack.c.bf16 %v115_v17, %v111_v16  ;;  %v225_v27 = vpack.c.bf16 %v117_v23, %v113_v22  ;;  %v571_v31 = vld [vmem:[#allocation8 + $0x60] sm:$0xff]  ;;  %v102_v41 = vld [vmem:[%s1420_s2 + $0xb8] sm:$0xff]  ;;  %v564_v56 = vld [vmem:[#allocation8 + $0x28] sm:$0xff] }
  0x35   :  { %v567_v37 = vld [vmem:[#allocation8 + $0x40] sm:$0xff]  ;;  %v218_v46 = vpack.c.bf16 %v102_v41, %v98_v40  ;;  %v566_v50 = vld [vmem:[#allocation8 + $0x38] sm:$0xff]  ;;  %v580_v59 = vld [vmem:[#allocation8 + $0xa8] sm:$0xff] }
  0x36   :  { %419 = vmatpush.bf16.msrb.mxu3 %v269_v25  ;;  %v214_v25 = vpack.c.bf16 %v94_v20, %v90_v19  ;;  %v589_v45 = vpack.c.bf16 %v568_v38, %v567_v37  ;;  %v582_v53 = vld [vmem:[#allocation8 + $0xb8] sm:$0xff]  ;;  %v579_v57 = vld [vmem:[#allocation8 + $0xa0] sm:$0xff]  ;;  %v561_v61 = vld [vmem:[#allocation8 + $0x10] sm:$0xff] }
  0x37   :  { %v595_v60 = vpack.c.bf16 %v580_v59, %v579_v57  ;;  %v562_v62 = vld [vmem:[#allocation8 + $0x18] sm:$0xff]  ;;  %v577_v63 = vld [vmem:[#allocation8 + $0x90] sm:$0xff]  ;;  %v132_v6 = vld [vmem:[%s1420_s2 + $0x1a8] sm:$0xff] }
  0x38   :  { %v106_v4 = vld [vmem:[%s1420_s2 + $0xd8] sm:$0xff]  ;;  %v129_v7 = vld [vmem:[%s1420_s2 + $0x190] sm:$0xff]  ;;  %v559_v9 = vld [vmem:[#allocation8] sm:$0xff] }
  0x39   :  { %v110_v5 = vld [vmem:[%s1420_s2 + $0xf8] sm:$0xff]  ;;  %v133_v8 = vld [vmem:[%s1420_s2 + $0x1b0] sm:$0xff]  ;;  %v560_v10 = vld [vmem:[#allocation8 + $0x8] sm:$0xff] }
  0x3a   :  { %420 = vmatpush.bf16.msrb.mxu3 %v268_v28  ;;  %v573_v28 = vld [vmem:[#allocation8 + $0x70] sm:$0xff]  ;;  %v575_v11 = vld [vmem:[#allocation8 + $0x80] sm:$0xff]  ;;  %v233_v16 = vpack.c.bf16 %v133_v8, %v129_v7  ;;  %v136_v18 = vld [vmem:[%s1420_s2 + $0x1c8] sm:$0xff] }
  0x3b   :  { %v592_v30 = vpack.c.bf16 %v574_v29, %v573_v28  ;;  %v114_v19 = vld [vmem:[%s1420_s2 + $0x118] sm:$0xff]  ;;  %v140_v21 = vld [vmem:[%s1420_s2 + $0x1e8] sm:$0xff]  ;;  %v137_v22 = vld [vmem:[%s1420_s2 + $0x1d0] sm:$0xff] }
  0x3c   :  { %v118_v20 = vld [vmem:[%s1420_s2 + $0x138] sm:$0xff]  ;;  %v141_v23 = vld [vmem:[%s1420_s2 + $0x1f0] sm:$0xff]  ;;  %v555_v29 = vld [vmem:[#allocation6] sm:$0xff] }
  0x3d   :  { %601 = vmatpush.bf16.msrb.mxu1 %v592_v30  ;;  %v126_v28 = vld [vmem:[%s1420_s2 + $0x178] sm:$0xff]  ;;  %v557_v30 = vld [vmem:[#allocation6 + $0x10] sm:$0xff]  ;;  %v468_v57 = vld [vmem:[#allocation3 + $0x8] sm:$0xff] }
  0x3e   :  { %421 = vmatpush.bf16.msrb.mxu3 %v267_v32  ;;  %v572_v32 = vld [vmem:[#allocation8 + $0x68] sm:$0xff]  ;;  %v583_v34 = vpack.c.bf16 %v557_v30, %v555_v29  ;;  %v130_v40 = vld [vmem:[%s1420_s2 + $0x198] sm:$0xff] }
  0x3f   :  { %v591_v33 = vpack.c.bf16 %v572_v32, %v571_v31  ;;  %v556_v31 = vld [vmem:[#allocation6 + $0x8] sm:$0xff]  ;;  %v558_v32 = vld [vmem:[#allocation6 + $0x18] sm:$0xff] }
  0x40   :  { %v584_v35 = vpack.c.bf16 %v558_v32, %v556_v31  ;;  %v134_v41 = vld [vmem:[%s1420_s2 + $0x1b8] sm:$0xff] }
  0x41   :  { %284 = vmatmul.bf16.gmra.mxu0 %v211_v43  ;;  %309 = vmatmul.bf16.gmra.mxu3 %v231_v44  ;;  %v121_v43 = vld [vmem:[%s1420_s2 + $0x150] sm:$0xff] }
  0x42   :  { %422 = vmatpush.bf16.msrb.mxu3 %v266_v42  ;;  %333 = vmatmul.bf16.gmra.mxu1 %v212_v47  ;;  %v124_v42 = vld [vmem:[%s1420_s2 + $0x168] sm:$0xff]  ;;  %v125_v44 = vld [vmem:[%s1420_s2 + $0x170] sm:$0xff] }
  0x43   :  { %382 = vmatmul.bf16.gmra.mxu2 %v213_v48  ;;  %602 = vmatpush.bf16.msrb.mxu1 %v591_v33  ;;  %v228_v47 = vpack.c.bf16 %v124_v42, %v120_v39  ;;  %v229_v48 = vpack.c.bf16 %v125_v44, %v121_v43  ;;  %v234_v44 = vpack.c.bf16 %v134_v41, %v130_v40 }
  0x46   :  { %423 = vmatpush.bf16.msrb.mxu3 %v265_v49  ;;  %v565_v49 = vld [vmem:[#allocation8 + $0x30] sm:$0xff] }
  0x47   :  { %603 = vmatpush.bf16.msrb.mxu1 %v590_v36  ;;  %v588_v51 = vpack.c.bf16 %v566_v50, %v565_v49  ;;  %v469_v49 = vld [vmem:[#allocation3 + $0x10] sm:$0xff]  ;;  %v470_v50 = vld [vmem:[#allocation3 + $0x18] sm:$0xff] }
  0x4a   :  { %424 = vmatpush.bf16.msrb.mxu3 %v264_v52  ;;  %v581_v52 = vld [vmem:[#allocation8 + $0xb0] sm:$0xff] }
  0x4b   :  { %604 = vmatpush.bf16.msrb.mxu1 %v589_v45  ;;  %v596_v54 = vpack.c.bf16 %v582_v53, %v581_v52  ;;  %v138_v52 = vld [vmem:[%s1420_s2 + $0x1d8] sm:$0xff] }
  0x4c   :  { %v142_v53 = vld [vmem:[%s1420_s2 + $0x1f8] sm:$0xff] }
  0x4d   :  { %619 = vmatpush.bf16.msrb.mxu2 %v596_v54  ;;  %v238_v59 = vpack.c.bf16 %v142_v53, %v138_v52 }
  0x4e   :  { %425 = vmatpush.bf16.msrb.mxu3 %v263_v55  ;;  %v563_v55 = vld [vmem:[#allocation8 + $0x20] sm:$0xff] }
  0x4f   :  { %605 = vmatpush.bf16.msrb.mxu1 %v588_v51  ;;  %v587_v58 = vpack.c.bf16 %v564_v56, %v563_v55  ;;  %v480_v51 = vpack.c.bf16 %v470_v50, %v469_v49  ;;  %v467_v56 = vld [vmem:[#allocation3] sm:$0xff] }
  0x51   :  { %289 = vmatmul.bf16.gmra.mxu0 %v215_v0  ;;  %314 = vmatmul.bf16.gmra.mxu3 %v235_v1  ;;  %v578_v0 = vld [vmem:[#allocation8 + $0x98] sm:$0xff]  ;;  %v586_v1 = vpack.c.bf16 %v562_v62, %v561_v61 }
  0x52   :  { %338 = vmatmul.bf16.gmra.mxu1 %v216_v2  ;;  %620 = vmatpush.bf16.msrb.mxu2 %v595_v60  ;;  %v594_v2 = vpack.c.bf16 %v578_v0, %v577_v63  ;;  %v479_v60 = vpack.c.bf16 %v468_v57, %v467_v56 }
  0x53   :  { %387 = vmatmul.bf16.gmra.mxu2 %v217_v3  ;;  %606 = vmatpush.bf16.msrb.mxu1 %v587_v58  ;;  %v128_v3 = vld [vmem:[%s1420_s2 + $0x188] sm:$0xff] }
  0x54   :  { %512 = vmatpush.bf16.msrb.mxu0 %v480_v51 }
  0x56   :  { %621 = vmatpush.bf16.msrb.mxu2 %v594_v2 }
  0x57   :  { %607 = vmatpush.bf16.msrb.mxu1 %v586_v1 }
  0x58   :  { %513 = vmatpush.bf16.msrb.mxu0 %v479_v60 }
  0x61   :  { %294 = vmatmul.bf16.gmra.mxu0 %v219_v12  ;;  %426 = vmatmul.bf16.vlgmr.msrb.gmra.mxu3 %v210_v13  ;;  %v222_v12 = vpack.c.bf16 %v110_v5, %v106_v4  ;;  %v585_v13 = vpack.c.bf16 %v560_v10, %v559_v9 }
  0x62   :  { %343 = vmatmul.bf16.gmra.mxu1 %v220_v14  ;;  %v576_v14 = vld [vmem:[#allocation8 + $0x88] sm:$0xff] }
  0x63   :  { %392 = vmatmul.bf16.gmra.mxu2 %v221_v15  ;;  %v232_v15 = vpack.c.bf16 %v132_v6, %v128_v3  ;;  %v593_v17 = vpack.c.bf16 %v576_v14, %v575_v11  ;;  %608 = vmatpush.bf16.msrb.mxu1 %v585_v13 }
  0x65   :  { %622 = vmatpush.bf16.msrb.mxu2 %v593_v17 }
  0x71   :  { %299 = vmatmul.bf16.gmra.mxu0 %v223_v24  ;;  %431 = vmatmul.bf16.gmra.mxu3 %v214_v25  ;;  %v226_v24 = vpack.c.bf16 %v118_v20, %v114_v19  ;;  %v236_v25 = vpack.c.bf16 %v140_v21, %v136_v18 }
  0x72   :  { %348 = vmatmul.bf16.gmra.mxu1 %v224_v26  ;;  %v237_v26 = vpack.c.bf16 %v141_v23, %v137_v22 }
  0x73   :  { %397 = vmatmul.bf16.gmra.mxu2 %v225_v27  ;;  %v122_v27 = vld [vmem:[%s1420_s2 + $0x158] sm:$0xff] }
  0x74   :  { %v230_v33 = vpack.c.bf16 %v126_v28, %v122_v27 }
  0x81   :  { %436 = vmatmul.bf16.gmra.mxu3 %v218_v46 }
  0x82   :  { %353 = vmatmul.bf16.gmra.mxu1 %v228_v47 }
  0x83   :  { %402 = vmatmul.bf16.gmra.mxu2 %v229_v48 }
  0x91   :  { %441 = vmatmul.bf16.gmra.mxu3 %v222_v12 }
  0x92   :  { %358 = vmatmul.bf16.gmra.mxu1 %v232_v15 }
  0x93   :  { %407 = vmatmul.bf16.gmra.mxu2 %v233_v16 }
  0xa1   :  { %446 = vmatmul.bf16.gmra.mxu3 %v226_v24 }
  0xa2   :  { %363 = vmatmul.bf16.gmra.mxu1 %v236_v25 }
  0xa3   :  { %412 = vmatmul.bf16.gmra.mxu2 %v237_v26 }
  0xae   :  { %v280_v54 = vpop.f32.mrf.mxu0 }
  0xaf   :  { %v329_v36 = vpop.f32.mrf.mxu1 }
  0xb0   :  { %v330_v8 = vadd.f32 %v329_v36, %v280_v54 }
  0xb1   :  { %451 = vmatmul.bf16.gmra.mxu3 %v230_v33 }
  0xb2   :  { %609 = vmatmul.bf16.vlgmr.msrb.gmra.mxu1 %v583_v34 }
  0xb3   :  { %755 = vmatmul.msk.bf16.vlgmr.msrb.gmra.mxu2 %vm597_vm0, %v584_v35 }
  0xb4   :  { %v1311_v37 = vpop.f32.mrf.mxu3 }
  0xb6   :  { %v378_v38 = vpop.f32.mrf.mxu2  ;;  %v282_v0 = vpop.f32.mrf.mxu0 }
  0xb7   :  { %v331_v39 = vpop.f32.mrf.mxu1  ;;  %v379_v12 = vadd.f32 %v378_v38, %v330_v8 }
  0xb8   :  { %v332_v10 = vadd.f32 %v331_v39, %v282_v0 }
  0xbc   :  { %v1319_v42 = vpop.f32.mrf.mxu3 }
  0xbe   :  { %v380_v43 = vpop.f32.mrf.mxu2  ;;  %v285_v5 = vpop.f32.mrf.mxu0 }
  0xbf   :  { %v334_v45 = vpop.f32.mrf.mxu1  ;;  %v381_v13 = vadd.f32 %v380_v43, %v332_v10 }
  0xc0   :  { %v335_v23 = vadd.f32 %v334_v45, %v285_v5 }
  0xc1   :  { %456 = vmatmul.bf16.gmra.mxu3 %v234_v44 }
  0xc4   :  { %v1321_v46 = vpop.f32.mrf.mxu3 }
  0xc6   :  { %v383_v47 = vpop.f32.mrf.mxu2  ;;  %v287_v11 = vpop.f32.mrf.mxu0 }
  0xc7   :  { %v336_v48 = vpop.f32.mrf.mxu1  ;;  %v384_v26 = vadd.f32 %v383_v47, %v335_v23 }
  0xc8   :  { %v337_v25 = vadd.f32 %v336_v48, %v287_v11 }
  0xcc   :  { %v1329_v55 = vpop.f32.mrf.mxu3 }
  0xce   :  { %v385_v58 = vpop.f32.mrf.mxu2  ;;  %v290_v20 = vpop.f32.mrf.mxu0 }
  0xcf   :  { %v339_v61 = vpop.f32.mrf.mxu1  ;;  %v386_v27 = vadd.f32 %v385_v58, %v337_v25 }
  0xd0   :  { %v340_v38 = vadd.f32 %v339_v61, %v290_v20 }
  0xd1   :  { %461 = vmatmul.bf16.gmra.mxu3 %v238_v59 }
  0xd4   :  { %v1331_v62 = vpop.f32.mrf.mxu3 }
  0xd6   :  { %v388_v63 = vpop.f32.mrf.mxu2  ;;  %v292_v32 = vpop.f32.mrf.mxu0 }
  0xd7   :  { %v341_v1 = vpop.f32.mrf.mxu1  ;;  %v389_v43 = vadd.f32 %v388_v63, %v340_v38 }
  0xd8   :  { %v342_v41 = vadd.f32 %v341_v1, %v292_v32 }
  0xdc   :  { %v1333_v2 = vpop.f32.mrf.mxu3 }
  0xde   :  { %v390_v3 = vpop.f32.mrf.mxu2  ;;  %v295_v40 = vpop.f32.mrf.mxu0 }
  0xdf   :  { %v344_v4 = vpop.f32.mrf.mxu1  ;;  %v391_v44 = vadd.f32 %v390_v3, %v342_v41 }
  0xe0   :  { %v345_v56 = vadd.f32 %v344_v4, %v295_v40 }
  0xe4   :  { %v427_v6 = vpop.f32.mrf.mxu3 }
  0xe5   :  { %v428_v15 = vadd.f32 %v427_v6, %v379_v12 }
  0xe6   :  { %v393_v7 = vpop.f32.mrf.mxu2  ;;  %v297_v52 = vpop.f32.mrf.mxu0 }
  0xe7   :  { %v346_v9 = vpop.f32.mrf.mxu1  ;;  %v394_v59 = vadd.f32 %v393_v7, %v345_v56 }
  0xe8   :  { %v347_v58 = vadd.f32 %v346_v9, %v297_v52 }
  0xec   :  { %v429_v14 = vpop.f32.mrf.mxu3 }
  0xed   :  { %v430_v17 = vadd.f32 %v429_v14, %v381_v13 }
  0xee   :  { %v395_v16 = vpop.f32.mrf.mxu2  ;;  %v300_v61 = vpop.f32.mrf.mxu0 }
  0xef   :  { %v471_v18 = vpack.c.bf16 %v430_v17, %v428_v15  ;;  %v349_v19 = vpop.f32.mrf.mxu1  ;;  %v396_v60 = vadd.f32 %v395_v16, %v347_v58 }
  0xf0   :  { %v350_v12 = vadd.f32 %v349_v19, %v300_v61 }
  0xf1   :  { %747 = vmatmul.msk.bf16.vlgmr.msrb.gmra.mxu0 %vm481_vm1, %v471_v18 }
  0xf4   :  { %v432_v21 = vpop.f32.mrf.mxu3 }
  0xf5   :  { %v433_v29 = vadd.f32 %v432_v21, %v384_v26 }
  0xf6   :  { %v398_v22 = vpop.f32.mrf.mxu2  ;;  %v302_v11 = vpop.f32.mrf.mxu0 }
  0xf7   :  { %v351_v24 = vpop.f32.mrf.mxu1  ;;  %v399_v4 = vadd.f32 %v398_v22, %v350_v12 }
  0xf8   :  { %v352_v13 = vadd.f32 %v351_v24, %v302_v11  ;;  %v658_v11 = vld [vmem:[%s1425_s7 + $0x48] sm:$0xff] }
  0xfc   :  { %v434_v28 = vpop.f32.mrf.mxu3 }
  0xfd   :  { %v435_v31 = vadd.f32 %v434_v28, %v386_v27 }
  0xfe   :  { %v400_v30 = vpop.f32.mrf.mxu2 }
  0xff   :  { %v472_v33 = vpack.c.bf16 %v435_v31, %v433_v29  ;;  %v354_v34 = vpop.f32.mrf.mxu1  ;;  %v401_v15 = vadd.f32 %v400_v30, %v352_v13 }
 0x100   :  { %v355_v25 = vadd.f32 %v354_v34, %v1311_v37 }
 0x101   :  { %748 = vmatmul.msk.bf16.gmra.mxu0 %vm481_vm1, %v472_v33  ;;  %v629_v33 = vld [vmem:[%s1424_s6] sm:$0xf] }
 0x102   :  { %v630_v37 = vpack.c.bf16 %v629_v33, %v629_v33 }
 0x104   :  { %v437_v35 = vpop.f32.mrf.mxu3 }
 0x105   :  { %v438_v47 = vadd.f32 %v437_v35, %v389_v43 }
 0x106   :  { %v403_v36 = vpop.f32.mrf.mxu2 }
 0x107   :  { %v356_v39 = vpop.f32.mrf.mxu1  ;;  %v404_v27 = vadd.f32 %v403_v36, %v355_v25  ;;  %v649_v25 = vld [vmem:[%s1425_s7] sm:$0xff] }
 0x108   :  { %v357_v26 = vadd.f32 %v356_v39, %v1319_v42 }
 0x10c   :  { %v439_v45 = vpop.f32.mrf.mxu3 }
 0x10d   :  { %v440_v49 = vadd.f32 %v439_v45, %v391_v44 }
 0x10e   :  { %v405_v48 = vpop.f32.mrf.mxu2 }
 0x10f   :  { %v473_v50 = vpack.c.bf16 %v440_v49, %v438_v47  ;;  %v359_v51 = vpop.f32.mrf.mxu1  ;;  %v406_v19 = vadd.f32 %v405_v48, %v357_v26  ;;  %v650_v26 = vld [vmem:[%s1425_s7 + $0x8] sm:$0xff] }
 0x110   :  { %v360_v34 = vadd.f32 %v359_v51, %v1321_v46 }
 0x111   :  { %749 = vmatmul.msk.bf16.gmra.mxu0 %vm481_vm1, %v473_v50 }
 0x114   :  { %v442_v53 = vpop.f32.mrf.mxu3 }
 0x115   :  { %v443_v63 = vadd.f32 %v442_v53, %v394_v59  ;;  %v663_v59 = vld [vmem:[%s1425_s7 + $0x70] sm:$0xff] }
 0x116   :  { %v408_v54 = vpop.f32.mrf.mxu2 }
 0x117   :  { %v361_v57 = vpop.f32.mrf.mxu1  ;;  %v409_v39 = vadd.f32 %v408_v54, %v360_v34 }
 0x118   :  { %v362_v36 = vadd.f32 %v361_v57, %v1329_v55 }
 0x11c   :  { %v444_v0 = vpop.f32.mrf.mxu3 }
 0x11d   :  { %v445_v3 = vadd.f32 %v444_v0, %v396_v60  ;;  %v664_v60 = vld [vmem:[%s1425_s7 + $0x78] sm:$0xff]  ;;  %v661_v0 = vld [vmem:[%s1425_s7 + $0x60] sm:$0xff] }
 0x11e   :  { %v410_v1 = vpop.f32.mrf.mxu2  ;;  %v673_v61 = vpack.c.bf16 %v664_v60, %v663_v59 }
 0x11f   :  { %v474_v5 = vpack.c.bf16 %v445_v3, %v443_v63  ;;  %v364_v6 = vpop.f32.mrf.mxu1  ;;  %v411_v40 = vadd.f32 %v410_v1, %v362_v36  ;;  %v662_v63 = vld [vmem:[%s1425_s7 + $0x68] sm:$0xff] }
 0x120   :  { %v365_v48 = vadd.f32 %v364_v6, %v1331_v62  ;;  %674 = vmatpush.bf16.msra.mxu1 %v673_v61  ;;  %v672_v3 = vpack.c.bf16 %v662_v63, %v661_v0  ;;  %v660_v6 = vld [vmem:[%s1425_s7 + $0x58] sm:$0xff] }
 0x121   :  { %750 = vmatmul.msk.bf16.gmra.mxu0 %vm481_vm1, %v474_v5  ;;  %v659_v5 = vld [vmem:[%s1425_s7 + $0x50] sm:$0xff] }
 0x124   :  { %v447_v8 = vpop.f32.mrf.mxu3  ;;  %675 = vmatpush.bf16.msra.mxu1 %v672_v3 }
 0x125   :  { %v448_v7 = vadd.f32 %v447_v8, %v399_v4  ;;  %v671_v8 = vpack.c.bf16 %v660_v6, %v659_v5  ;;  %v655_v4 = vld [vmem:[%s1425_s7 + $0x30] sm:$0xff] }
 0x126   :  { %v413_v10 = vpop.f32.mrf.mxu2 }
 0x127   :  { %v366_v14 = vpop.f32.mrf.mxu1  ;;  %v414_v50 = vadd.f32 %v413_v10, %v365_v48  ;;  %v657_v10 = vld [vmem:[%s1425_s7 + $0x40] sm:$0xff] }
 0x128   :  { %v367_v49 = vadd.f32 %v366_v14, %v1333_v2  ;;  %676 = vmatpush.bf16.msra.mxu1 %v671_v8  ;;  %v670_v13 = vpack.c.bf16 %v658_v11, %v657_v10 }
 0x12c   :  { %v449_v9 = vpop.f32.mrf.mxu3  ;;  %677 = vmatpush.bf16.msra.mxu1 %v670_v13 }
 0x12d   :  { %v450_v17 = vadd.f32 %v449_v9, %v401_v15  ;;  %v656_v15 = vld [vmem:[%s1425_s7 + $0x38] sm:$0xff] }
 0x12e   :  { %v415_v16 = vpop.f32.mrf.mxu2  ;;  %v669_v9 = vpack.c.bf16 %v656_v15, %v655_v4 }
 0x12f   :  { %v475_v18 = vpack.c.bf16 %v450_v17, %v448_v7  ;;  %v610_v20 = vpop.f32.mrf.mxu1  ;;  %v416_v52 = vadd.f32 %v415_v16, %v367_v49  ;;  %v653_v7 = vld [vmem:[%s1425_s7 + $0x20] sm:$0xff]  ;;  %v654_v16 = vld [vmem:[%s1425_s7 + $0x28] sm:$0xff] }
 0x130   :  { %678 = vmatpush.bf16.msra.mxu1 %v669_v9 }
 0x131   :  { %751 = vmatmul.msk.bf16.gmra.mxu0 %vm481_vm1, %v475_v18  ;;  %v668_v18 = vpack.c.bf16 %v654_v16, %v653_v7 }
 0x134   :  { %v452_v21 = vpop.f32.mrf.mxu3  ;;  %679 = vmatpush.bf16.msra.mxu1 %v668_v18 }
 0x135   :  { %v453_v28 = vadd.f32 %v452_v21, %v404_v27  ;;  %v652_v21 = vld [vmem:[%s1425_s7 + $0x18] sm:$0xff] }
 0x136   :  { %v624_v23 = vpop.f32.mrf.mxu2 }
 0x137   :  { %v612_v22 = vpop.f32.mrf.mxu1  ;;  %v625_v31 = vadd.f32 %v624_v23, %v610_v20  ;;  %v651_v20 = vld [vmem:[%s1425_s7 + $0x10] sm:$0xff] }
 0x138   :  { %v667_v23 = vpack.c.bf16 %v652_v21, %v651_v20 }
 0x13a   :  { %680 = vmatpush.bf16.msra.mxu1 %v667_v23 }
 0x13c   :  { %v454_v24 = vpop.f32.mrf.mxu3 }
 0x13d   :  { %v455_v29 = vadd.f32 %v454_v24, %v406_v19  ;;  %v666_v19 = vpack.c.bf16 %v650_v26, %v649_v25 }
 0x13e   :  { %v626_v30 = vpop.f32.mrf.mxu2 }
 0x13f   :  { %v627_v32 = vadd.f32 %v626_v30, %v612_v22  ;;  %v476_v35 = vpack.c.bf16 %v455_v29, %v453_v28  ;;  %681 = vmatpush.bf16.msra.mxu1 %v666_v19 }
 0x141   :  { %v631_v38 = vpack.c.bf16 %v627_v32, %v625_v31  ;;  %752 = vmatmul.msk.bf16.gmra.mxu0 %vm481_vm1, %v476_v35 }
 0x143   :  { %643 = vmatpush.bf16.msra.mxu3 %v631_v38 }
 0x144   :  { %v457_v42 = vpop.f32.mrf.mxu3 }
 0x145   :  { %v458_v43 = vadd.f32 %v457_v42, %v409_v39 }
 0x146   :  { %756 = vmatmul.msk.bf16.vlgmr.msra.gmra.mxu3 %vm632_vm2, %v630_v37 }
 0x14c   :  { %v459_v41 = vpop.f32.mrf.mxu3 }
 0x14d   :  { %v460_v44 = vadd.f32 %v459_v41, %v411_v40 }
 0x14f   :  { %v477_v45 = vpack.c.bf16 %v460_v44, %v458_v43 }
 0x151   :  { %753 = vmatmul.msk.bf16.gmra.mxu0 %vm481_vm1, %v477_v45 }
 0x154   :  { %v462_v47 = vpop.f32.mrf.mxu3 }
 0x155   :  { %v463_v56 = vadd.f32 %v462_v47, %v414_v50 }
 0x15c   :  { %v464_v53 = vpop.f32.mrf.mxu3 }
 0x15d   :  { %v465_v46 = vadd.f32 %v464_v53, %v416_v52 }
 0x15f   :  { %v478_v51 = vpack.c.bf16 %v465_v46, %v463_v56 }
 0x161   :  { %754 = vmatmul.msk.bf16.gmra.mxu0 %vm481_vm1, %v478_v51 }
 0x16e   :  { %v1352_v55 = vpop.f32.mrf.mxu0 }
 0x176   :  { %v1354_v54 = vpop.f32.mrf.mxu0 }
 0x177   :  { %v704_v57 = vpack.c.bf16 %v1354_v54, %v1352_v55  ;;  %v726_v54 = vstv %s1418_s0 }
 0x17e   :  { %v1358_v58 = vpop.f32.mrf.mxu0 }
 0x186   :  { %v522_v62 = vpop.f32.mrf.mxu0 }
 0x187   :  { %v705_v2 = vpack.c.bf16 %v522_v62, %v1358_v58 }
 0x18e   :  { %v525_v1 = vpop.f32.mrf.mxu0 }
 0x196   :  { %v527_v12 = vpop.f32.mrf.mxu0 }
 0x197   :  { %v706_v14 = vpack.c.bf16 %v527_v12, %v525_v1 }
 0x19e   :  { %v530_v17 = vpop.f32.mrf.mxu0 }
 0x1a6   :  { %v532_v27 = vpop.f32.mrf.mxu0 }
 0x1a7   :  { %v707_v24 = vpack.c.bf16 %v532_v27, %v530_v17 }
 0x1ae   :  { %v535_v28 = vpop.f32.mrf.mxu0 }
 0x1b6   :  { %v537_v22 = vpop.f32.mrf.mxu0 }
 0x1b7   :  { %v708_v29 = vpack.c.bf16 %v537_v22, %v535_v28 }
 0x1be   :  { %v540_v30 = vpop.f32.mrf.mxu0 }
 0x1c6   :  { %v542_v31 = vpop.f32.mrf.mxu0 }
 0x1c7   :  { %v709_v40 = vpack.c.bf16 %v542_v31, %v540_v30 }
 0x1c9   :  { %v645_v32 = vpop.f32.mrf.mxu3 }
 0x1ca   :  { %v665_v33 = vpack.c.bf16 %v645_v32, %v645_v32 }
 0x1cc   :  { %682 = vmatmul.bf16.vlgmr.msra.gmra.mxu1 %v665_v33 }
 0x1ce   :  { %v545_v35 = vpop.f32.mrf.mxu0 }
 0x1d1   :  { %v647_v38 = vpop.f32.mrf.mxu3 }
 0x1d6   :  { %v547_v37 = vpop.f32.mrf.mxu0 }
 0x1d7   :  { %v710_v39 = vpack.c.bf16 %v547_v37, %v545_v35 }
 0x1de   :  { %v550_v42 = vpop.f32.mrf.mxu0 }
 0x1e6   :  { %v552_v34 = vpop.f32.mrf.mxu0 }
 0x1e7   :  { %v711_v36 = vpack.c.bf16 %v552_v34, %v550_v42 }
 0x1e9   :  { %712 = vmatpush.bf16.xpose.msra.mxu2 %v711_v36 }
 0x1f1   :  { %713 = vmatpush.bf16.xpose.msra.mxu2 %v710_v39 }
 0x1f9   :  { %714 = vmatpush.bf16.xpose.msra.mxu2 %v709_v40 }
 0x201   :  { %715 = vmatpush.bf16.xpose.msra.mxu2 %v708_v29 }
 0x209   :  { %716 = vmatpush.bf16.xpose.msra.mxu2 %v707_v24 }
 0x211   :  { %717 = vmatpush.bf16.xpose.msra.mxu2 %v706_v14 }
 0x219   :  { %718 = vmatpush.bf16.xpose.msra.mxu2 %v705_v2 }
 0x221   :  { %719 = vmatpush.bf16.xpose.msra.mxu2 %v704_v57 }
 0x249   :  { %v683_v41 = vpop.f32.mrf.mxu1 }
 0x24a   :  { %v687_v43 = vmul.f32 %v683_v41, %v683_v41 }
 0x24c   :  { %v689_v44 = vsel %vm688_vm3, %v687_v43, 0.0 }
 0x24d   :  { %690 = vadd.xlane.f32.xlu0 %v689_v44 }
 0x251   :  { %v685_v45 = vpop.f32.mrf.mxu1 }
 0x2c0   :  { %v691_v47 = vpop.xlane.xlu0 %690 }
 0x2c1   :  { %773 = vrsqrt.f32 %v691_v47  ;;  %vm698_vm5 = vweird.f32 %v691_v47 }
 0x2c7   :  { %v774_v48 = vpop.eup %773 }
 0x2c8   :  { %v693_v49 = vmul.f32 %v774_v48, %v691_v47  ;;  %vm699_vm4 = vweird.f32 %v774_v48 }
 0x2c9   :  { %vm700_vm6 = vmor %vm698_vm5, %vm699_vm4 }
 0x2ca   :  { %v694_v50 = vmul.f32 %v774_v48, %v693_v49 }
 0x2cc   :  { %v695_v52 = vmul.f32 0.5, %v694_v50 }
 0x2ce   :  { %v696_v53 = vsub.f32 1.5, %v695_v52 }
 0x2d0   :  { %v697_v56 = vmul.f32 %v774_v48, %v696_v53 }
 0x2d2   :  { %v701_v46 = vsel %vm700_vm6, %v774_v48, %v697_v56 }
 0x2d3   :  { %v702_v51 = vmul.f32 %v701_v46, %v683_v41 }
 0x2d5   :  { %v703_v55 = vpack.c.bf16 %v702_v51, %v702_v51 }
 0x2d7   :  { %720 = vmatmul.bf16.vlgmr.msra.gmra.mxu2 %v703_v55 }
 0x35a   :  { %v721_v57 = vpop.f32.mrf.mxu2 }
 0x35b   :  { %v727_v58 = vmul.f32 %v726_v54, %v721_v57 }
 0x35d   :  { %728 = vst [vmem:[#allocation9] sm:$0xf] %v727_v58 }
 0x35e   :  { %739 = dma.vmem_to_hbm [thread:$0]  %s735_s29, 64, %s737_s10, [#allocation5]  }
 0x362   :  { %v723_v62 = vpop.f32.mrf.mxu2 }
 0x363   :  { %875 = dma.done.wait [#allocation5], 64  }
 0x364   :  { %876 = vsyncadd [#allocation5], 4294967232 }
 0x365   :  { %744 = vsyncpa [#allocation4], 1 }
 0x366   :  { %745 = vsyncpa [#allocation7], 1 }
 0x367   :  { %746 = vsyncpa [#allocation5], 1 }

</bundles_post_ra>
